<compile_context>
chip_gen: v7x
topology: tpu7x:2x2x1
jax: 0.10.0
libtpu: 0.0.40
codegen_flags: <defaults>
</compile_context>

<pallas_src>
import functools
import math

import jax
import jax.numpy as jnp
from jax.experimental import pallas as pl
from jax.experimental.pallas import tpu as pltpu


def _mlp(x, w1, b1, w2, b2):
    h = jnp.dot(x, w1, preferred_element_type=jnp.float32) + b1
    h = h * jax.nn.sigmoid(h)  # SiLU
    return jnp.dot(h, w2, preferred_element_type=jnp.float32) + b2


def _layer_norm(x, eps=1e-5):
    # nn.LayerNorm with default init (gamma=1, beta=0).
    mu = jnp.mean(x, axis=-1, keepdims=True)
    var = jnp.mean((x - mu) ** 2, axis=-1, keepdims=True)
    return (x - mu) * jax.lax.rsqrt(var + eps)


def attention_fusion_kernel(num_heads, layer_norm,
                            scene_ref, obj_ref, mask_ref, head_mask_ref,
                            wq_ref, bq_ref, wkv_ref, bkv_ref,
                            w1o_ref, b1o_ref, w2o_ref, b2o_ref,
                            w1f_ref, b1f_ref, w2f_ref, b2f_ref,
                            fused_ref, attn_ref):
    B, N, D = obj_ref.shape
    H = num_heads
    hd = D // H
    inv_scale = 1.0 / math.sqrt(hd)

    scene = scene_ref[...]                       # [B, S]
    obj2d = obj_ref[...].reshape(B * N, D)       # [B*N, D]
    valid = mask_ref[...] > 0.5                  # [B, N]
    head_mask = head_mask_ref[...]               # [H, D]; 1.0 where lane d belongs to head h

    # ---- projections (MXU) ----
    q = jnp.dot(scene, wq_ref[...], preferred_element_type=jnp.float32) + bq_ref[...]     # [B, D]
    q = q * inv_scale                                                                      # fold 1/sqrt(hd)
    kv = jnp.dot(obj2d, wkv_ref[...], preferred_element_type=jnp.float32) + bkv_ref[...]  # [B*N, 2D]
    k = kv[:, :D].reshape(B, N, D)               # [B, N, D]
    v = kv[:, D:].reshape(B, N, D)               # [B, N, D]

    # ---- batched masked per-head attention (no per-head slicing) ----
    # q_blk[b, h, :] = q[b, :] restricted to head h's lane block; contracting over the
    # full D against k then reproduces per-head dot products in one batched matmul.
    q_blk = q[:, None, :] * head_mask[None, :, :]                              # [B, H, D]
    logits = jnp.einsum('bhd,bnd->bhn', q_blk, k,
                        preferred_element_type=jnp.float32)                    # [B, H, N]
    # PyTorch semantics: masked_fill(~mask, 0.0) on the *logits* (not -inf).
    logits = jnp.where(valid[:, None, :], logits, 0.0)

    m = jnp.max(logits, axis=-1, keepdims=True)
    e = jnp.exp(logits - m)
    denom = jnp.sum(e, axis=-1, keepdims=True)
    attn = e * pl.reciprocal(denom, approx=True)                               # [B, H, N]

    ctx_full = jnp.einsum('bhn,bnd->bhd', attn, v,
                          preferred_element_type=jnp.float32)                  # [B, H, D]
    # Keep only head h's lane block from row h, sum over heads -> concat layout
    # identical to PyTorch's transpose(1,2).reshape(B, obj_dim) (index = h*hd + d).
    context = jnp.sum(ctx_full * head_mask[None, :, :], axis=1)                # [B, D]

    # ---- MLPs + residuals ----
    context_residual = context + _mlp(context, w1o_ref[...], b1o_ref[...],
                                      w2o_ref[...], b2o_ref[...])
    if layer_norm:
        context_residual = _layer_norm(context_residual)
    fused = context_residual + _mlp(context_residual, w1f_ref[...], b1f_ref[...],
                                    w2f_ref[...], b2f_ref[...])
    if layer_norm:
        fused = _layer_norm(fused)

    fused_ref[...] = fused.astype(fused_ref.dtype)
    attn_ref[...] = jnp.mean(attn, axis=1).astype(attn_ref.dtype)              # [B, N]


def attention_fusion(scene_state, obj_embeds, mask, params,
                     *, num_heads, layer_norm=False):
    (wq, bq, wk, bk, wv, bv,
     w1o, b1o, w2o, b2o, w1f, b1f, w2f, b2f) = params
    B, N, D = obj_embeds.shape
    hd = D // num_heads

    # Fuse K/V projections: one [D, 2D] matmul instead of two [D, D] matmuls.
    wkv = jnp.concatenate([wk, wv], axis=1)      # [D, 2D]
    bkv = jnp.concatenate([bk, bv], axis=1)      # [1, 2D]

    # Constant head-membership mask: head_mask[h, d] = 1.0 iff d // hd == h.
    head_mask = (jnp.arange(D)[None, :] // hd
                 == jnp.arange(num_heads)[:, None]).astype(jnp.float32)        # [H, D]

    kernel = functools.partial(attention_fusion_kernel, num_heads, layer_norm)
    vmem = pl.BlockSpec(memory_space=pltpu.MemorySpace.VMEM)
    ins = (scene_state, obj_embeds, mask.astype(jnp.float32), head_mask,
           wq, bq, wkv, bkv, w1o, b1o, w2o, b2o, w1f, b1f, w2f, b2f)
    return pl.pallas_call(
        kernel,
        out_shape=(jax.ShapeDtypeStruct((B, D), jnp.float32),
                   jax.ShapeDtypeStruct((B, N), jnp.float32)),
        in_specs=[vmem] * len(ins),
        out_specs=(vmem, vmem),
    )(*ins)


def init_params(key, scene_dim, obj_dim, ff_dim):
    """Deterministic nn.Linear-style init (uniform +-1/sqrt(fan_in))."""
    def linear(k, fan_in, fan_out):
        kw, kb = jax.random.split(k)
        bound = 1.0 / math.sqrt(fan_in)
        w = jax.random.uniform(kw, (fan_in, fan_out), jnp.float32, -bound, bound)
        b = jax.random.uniform(kb, (1, fan_out), jnp.float32, -bound, bound)
        return w, b

    ks = jax.random.split(key, 7)
    wq, bq = linear(ks[0], scene_dim, obj_dim)
    wk, bk = linear(ks[1], obj_dim, obj_dim)
    wv, bv = linear(ks[2], obj_dim, obj_dim)
    w1o, b1o = linear(ks[3], obj_dim, ff_dim)
    w2o, b2o = linear(ks[4], ff_dim, obj_dim)
    w1f, b1f = linear(ks[5], obj_dim, ff_dim)
    w2f, b2f = linear(ks[6], ff_dim, obj_dim)
    return (wq, bq, wk, bk, wv, bv, w1o, b1o, w2o, b2o, w1f, b1f, w2f, b2f)


def reference(scene, obj, mask, params, num_heads):
    """Plain-JAX re-implementation of the PyTorch forward, for validation."""
    (wq, bq, wk, bk, wv, bv, w1o, b1o, w2o, b2o, w1f, b1f, w2f, b2f) = params
    B, N, D = obj.shape
    H = num_heads
    hd = D // H
    q = scene @ wq + bq
    k = obj @ wk + bk
    v = obj @ wv + bv
    q = q.reshape(B, 1, H, hd).transpose(0, 2, 1, 3)
    k = k.reshape(B, N, H, hd).transpose(0, 2, 1, 3)
    v = v.reshape(B, N, H, hd).transpose(0, 2, 1, 3)
    logits = jnp.einsum('bhqd,bhkd->bhqk', q, k) / math.sqrt(hd)
    logits = jnp.where(mask[:, None, None, :], logits, 0.0)
    attn = jax.nn.softmax(logits, axis=-1)
    ctx = jnp.einsum('bhqk,bhkd->bhqd', attn, v)
    ctx = ctx.transpose(0, 2, 1, 3).reshape(B, D)

    def mlp(x, w1, b1, w2, b2):
        h = jax.nn.silu(x @ w1 + b1)
        return h @ w2 + b2

    cr = ctx + mlp(ctx, w1o, b1o, w2o, b2o)
    fused = cr + mlp(cr, w1f, b1f, w2f, b2f)
    mean_attn = attn.mean(axis=1).squeeze(1)
    return fused, mean_attn


if __name__ == "__main__":
    B, SCENE_DIM, OBJ_DIM, FF_DIM, NUM_HEADS, MAX_N = 2, 32, 16, 32, 4, 8

    root = jax.random.PRNGKey(0)
    k_scene, k_obj, k_param = jax.random.split(root, 3)

    scene_state = jax.random.normal(k_scene, (B, SCENE_DIM), jnp.float32)
    obj_embeds = jax.random.normal(k_obj, (B, MAX_N, OBJ_DIM), jnp.float32)
    lengths = jnp.array([MAX_N, 5], dtype=jnp.int32)
    mask = jnp.arange(MAX_N)[None, :] < lengths[:, None]          # [B, max_n] bool

    params = init_params(k_param, SCENE_DIM, OBJ_DIM, FF_DIM)

    fused_out, mean_attention = attention_fusion(
        scene_state, obj_embeds, mask, params,
        num_heads=NUM_HEADS, layer_norm=False)
    jax.block_until_ready((fused_out, mean_attention))

    ref_fused, ref_attn = reference(scene_state, obj_embeds, mask, params, NUM_HEADS)
    assert fused_out.shape == (B, OBJ_DIM) and mean_attention.shape == (B, MAX_N)
    assert jnp.allclose(fused_out, ref_fused, atol=2e-3, rtol=2e-3)
    assert jnp.allclose(mean_attention, ref_attn, atol=2e-3, rtol=2e-3)

    print("KERNEL_OK")
</pallas_src>

<mosaic_0001>
module attributes {stable_mosaic.version = 11 : i64} {
  func.func @attention_fusion_kernel(%arg0: memref<2x32xf32, #tpu.memory_space<vmem>>, %arg1: memref<2x8x16xf32, #tpu.memory_space<vmem>>, %arg2: memref<2x8xf32, #tpu.memory_space<vmem>>, %arg3: memref<4x16xf32, #tpu.memory_space<vmem>>, %arg4: memref<32x16xf32, #tpu.memory_space<vmem>>, %arg5: memref<1x16xf32, #tpu.memory_space<vmem>>, %arg6: memref<16x32xf32, #tpu.memory_space<vmem>>, %arg7: memref<1x32xf32, #tpu.memory_space<vmem>>, %arg8: memref<16x32xf32, #tpu.memory_space<vmem>>, %arg9: memref<1x32xf32, #tpu.memory_space<vmem>>, %arg10: memref<32x16xf32, #tpu.memory_space<vmem>>, %arg11: memref<1x16xf32, #tpu.memory_space<vmem>>, %arg12: memref<16x32xf32, #tpu.memory_space<vmem>>, %arg13: memref<1x32xf32, #tpu.memory_space<vmem>>, %arg14: memref<32x16xf32, #tpu.memory_space<vmem>>, %arg15: memref<1x16xf32, #tpu.memory_space<vmem>>, %arg16: memref<2x16xf32, #tpu.memory_space<vmem>>, %arg17: memref<2x8xf32, #tpu.memory_space<vmem>>) attributes {dimension_semantics = [], scalar_prefetch = 0 : i64, scratch_operands = 0 : i64, tpu.core_type = #tpu.core_type<tc>} {
    %c0 = arith.constant 0 : index
    %c0_0 = arith.constant 0 : index
    %0 = vector.load %arg0[%c0, %c0_0] : memref<2x32xf32, #tpu.memory_space<vmem>>, vector<2x32xf32>
    %c0_1 = arith.constant 0 : index
    %c0_2 = arith.constant 0 : index
    %c0_3 = arith.constant 0 : index
    %1 = vector.load %arg1[%c0_1, %c0_2, %c0_3] : memref<2x8x16xf32, #tpu.memory_space<vmem>>, vector<2x8x16xf32>
    %2 = vector.shape_cast %1 : vector<2x8x16xf32> to vector<16x16xf32>
    %c0_4 = arith.constant 0 : index
    %c0_5 = arith.constant 0 : index
    %3 = vector.load %arg2[%c0_4, %c0_5] : memref<2x8xf32, #tpu.memory_space<vmem>>, vector<2x8xf32>
    %cst = arith.constant 5.000000e-01 : f32
    %4 = vector.broadcast %cst : f32 to vector<2x8xf32>
    %5 = arith.cmpf ogt, %3, %4 : vector<2x8xf32>
    %c0_6 = arith.constant 0 : index
    %c0_7 = arith.constant 0 : index
    %6 = vector.load %arg3[%c0_6, %c0_7] : memref<4x16xf32, #tpu.memory_space<vmem>>, vector<4x16xf32>
    %c0_8 = arith.constant 0 : index
    %c0_9 = arith.constant 0 : index
    %7 = vector.load %arg4[%c0_8, %c0_9] : memref<32x16xf32, #tpu.memory_space<vmem>>, vector<32x16xf32>
    %cst_10 = arith.constant dense<0.000000e+00> : vector<2x16xf32>
    %8 = tpu.matmul %0, %7, %cst_10 {dimension_numbers = #tpu.dot_dimension_numbers<[1], [0], [0], [1], [0, 0, 1, 1], [], []>} : vector<2x32xf32>, vector<32x16xf32>, vector<2x16xf32> -> vector<2x16xf32>
    %c0_11 = arith.constant 0 : index
    %c0_12 = arith.constant 0 : index
    %9 = vector.load %arg5[%c0_11, %c0_12] : memref<1x16xf32, #tpu.memory_space<vmem>>, vector<1x16xf32>
    %10 = vector.broadcast %9 : vector<1x16xf32> to vector<2x16xf32>
    %11 = arith.addf %8, %10 : vector<2x16xf32>
    %cst_13 = arith.constant 5.000000e-01 : f32
    %12 = vector.broadcast %cst_13 : f32 to vector<2x16xf32>
    %13 = arith.mulf %11, %12 : vector<2x16xf32>
    %c0_14 = arith.constant 0 : index
    %c0_15 = arith.constant 0 : index
    %14 = vector.load %arg6[%c0_14, %c0_15] : memref<16x32xf32, #tpu.memory_space<vmem>>, vector<16x32xf32>
    %cst_16 = arith.constant dense<0.000000e+00> : vector<16x32xf32>
    %15 = tpu.matmul %2, %14, %cst_16 {dimension_numbers = #tpu.dot_dimension_numbers<[1], [0], [0], [1], [0, 0, 1, 1], [], []>} : vector<16x16xf32>, vector<16x32xf32>, vector<16x32xf32> -> vector<16x32xf32>
    %c0_17 = arith.constant 0 : index
    %c0_18 = arith.constant 0 : index
    %16 = vector.load %arg7[%c0_17, %c0_18] : memref<1x32xf32, #tpu.memory_space<vmem>>, vector<1x32xf32>
    %17 = vector.broadcast %16 : vector<1x32xf32> to vector<16x32xf32>
    %18 = arith.addf %15, %17 : vector<16x32xf32>
    %19 = vector.extract_strided_slice %18 {offsets = [0, 0], sizes = [16, 16], strides = [1, 1]} : vector<16x32xf32> to vector<16x16xf32>
    %20 = vector.shape_cast %19 : vector<16x16xf32> to vector<2x8x16xf32>
    %21 = vector.extract_strided_slice %18 {offsets = [0, 16], sizes = [16, 16], strides = [1, 1]} : vector<16x32xf32> to vector<16x16xf32>
    %22 = vector.shape_cast %21 : vector<16x16xf32> to vector<2x8x16xf32>
    %23 = vector.shape_cast %13 : vector<2x16xf32> to vector<2x1x16xf32>
    %24 = vector.shape_cast %6 : vector<4x16xf32> to vector<1x4x16xf32>
    %25 = vector.broadcast %23 : vector<2x1x16xf32> to vector<2x4x16xf32>
    %26 = vector.broadcast %24 : vector<1x4x16xf32> to vector<2x4x16xf32>
    %27 = arith.mulf %25, %26 : vector<2x4x16xf32>
    "tpu.trace_start"() <{level = 10 : i32, message = "bhd,bnd->bhn"}> : () -> ()
    %cst_19 = arith.constant dense<0.000000e+00> : vector<2x4x8xf32>
    %28 = tpu.matmul %27, %20, %cst_19 {dimension_numbers = #tpu.dot_dimension_numbers<[2], [2], [1], [1], [0, 0, 0, 1, 1, 1], [0], [0]>} : vector<2x4x16xf32>, vector<2x8x16xf32>, vector<2x4x8xf32> -> vector<2x4x8xf32>
    "tpu.trace_stop"() : () -> ()
    %29 = vector.shape_cast %5 : vector<2x8xi1> to vector<2x1x8xi1>
    %cst_20 = arith.constant 0.000000e+00 : f32
    %30 = vector.shape_cast %29 : vector<2x1x8xi1> to vector<2x1x8xi1>
    %31 = vector.broadcast %30 : vector<2x1x8xi1> to vector<2x4x8xi1>
    %32 = vector.broadcast %cst_20 : f32 to vector<2x4x8xf32>
    %33 = arith.select %31, %28, %32 : vector<2x4x8xi1>, vector<2x4x8xf32>
    %cst_21 = arith.constant dense<0xFF800000> : vector<2x4xf32>
    %34 = vector.multi_reduction <maximumf>, %33, %cst_21 [2] : vector<2x4x8xf32> to vector<2x4xf32>
    %35 = vector.shape_cast %34 : vector<2x4xf32> to vector<2x4x1xf32>
    %36 = vector.broadcast %35 : vector<2x4x1xf32> to vector<2x4x8xf32>
    %37 = arith.subf %33, %36 : vector<2x4x8xf32>
    %38 = math.exp %37 : vector<2x4x8xf32>
    %cst_22 = arith.constant dense<0.000000e+00> : vector<2x4xf32>
    %39 = vector.multi_reduction <add>, %38, %cst_22 [2] : vector<2x4x8xf32> to vector<2x4xf32>
    %40 = vector.shape_cast %39 : vector<2x4xf32> to vector<2x4x1xf32>
    %41 = tpu.reciprocal %40 {approx = true} : vector<2x4x1xf32> -> vector<2x4x1xf32>
    %42 = vector.broadcast %41 : vector<2x4x1xf32> to vector<2x4x8xf32>
    %43 = arith.mulf %38, %42 : vector<2x4x8xf32>
    "tpu.trace_start"() <{level = 10 : i32, message = "bhn,bnd->bhd"}> : () -> ()
    %cst_23 = arith.constant dense<0.000000e+00> : vector<2x4x16xf32>
    %44 = tpu.matmul %43, %22, %cst_23 {dimension_numbers = #tpu.dot_dimension_numbers<[2], [1], [1], [2], [0, 0, 0, 1, 1, 2], [0], [0]>} : vector<2x4x8xf32>, vector<2x8x16xf32>, vector<2x4x16xf32> -> vector<2x4x16xf32>
    "tpu.trace_stop"() : () -> ()
    %45 = vector.shape_cast %6 : vector<4x16xf32> to vector<1x4x16xf32>
    %46 = vector.broadcast %45 : vector<1x4x16xf32> to vector<2x4x16xf32>
    %47 = arith.mulf %44, %46 : vector<2x4x16xf32>
    %cst_24 = arith.constant dense<0.000000e+00> : vector<2x16xf32>
    %48 = vector.multi_reduction <add>, %47, %cst_24 [1] : vector<2x4x16xf32> to vector<2x16xf32>
    %c0_25 = arith.constant 0 : index
    %c0_26 = arith.constant 0 : index
    %49 = vector.load %arg8[%c0_25, %c0_26] : memref<16x32xf32, #tpu.memory_space<vmem>>, vector<16x32xf32>
    %c0_27 = arith.constant 0 : index
    %c0_28 = arith.constant 0 : index
    %50 = vector.load %arg9[%c0_27, %c0_28] : memref<1x32xf32, #tpu.memory_space<vmem>>, vector<1x32xf32>
    %c0_29 = arith.constant 0 : index
    %c0_30 = arith.constant 0 : index
    %51 = vector.load %arg10[%c0_29, %c0_30] : memref<32x16xf32, #tpu.memory_space<vmem>>, vector<32x16xf32>
    %c0_31 = arith.constant 0 : index
    %c0_32 = arith.constant 0 : index
    %52 = vector.load %arg11[%c0_31, %c0_32] : memref<1x16xf32, #tpu.memory_space<vmem>>, vector<1x16xf32>
    %cst_33 = arith.constant dense<0.000000e+00> : vector<2x32xf32>
    %53 = tpu.matmul %48, %49, %cst_33 {dimension_numbers = #tpu.dot_dimension_numbers<[1], [0], [0], [1], [0, 0, 1, 1], [], []>} : vector<2x16xf32>, vector<16x32xf32>, vector<2x32xf32> -> vector<2x32xf32>
    %54 = vector.broadcast %50 : vector<1x32xf32> to vector<2x32xf32>
    %55 = arith.addf %53, %54 : vector<2x32xf32>
    %56 = arith.negf %55 : vector<2x32xf32>
    %57 = math.exp %56 : vector<2x32xf32>
    %cst_34 = arith.constant 1.000000e+00 : f32
    %58 = vector.broadcast %cst_34 : f32 to vector<2x32xf32>
    %59 = arith.addf %58, %57 : vector<2x32xf32>
    %60 = arith.divf %58, %59 : vector<2x32xf32>
    %61 = arith.mulf %55, %60 : vector<2x32xf32>
    %cst_35 = arith.constant dense<0.000000e+00> : vector<2x16xf32>
    %62 = tpu.matmul %61, %51, %cst_35 {dimension_numbers = #tpu.dot_dimension_numbers<[1], [0], [0], [1], [0, 0, 1, 1], [], []>} : vector<2x32xf32>, vector<32x16xf32>, vector<2x16xf32> -> vector<2x16xf32>
    %63 = vector.broadcast %52 : vector<1x16xf32> to vector<2x16xf32>
    %64 = arith.addf %62, %63 : vector<2x16xf32>
    %65 = arith.addf %48, %64 : vector<2x16xf32>
    %c0_36 = arith.constant 0 : index
    %c0_37 = arith.constant 0 : index
    %66 = vector.load %arg12[%c0_36, %c0_37] : memref<16x32xf32, #tpu.memory_space<vmem>>, vector<16x32xf32>
    %c0_38 = arith.constant 0 : index
    %c0_39 = arith.constant 0 : index
    %67 = vector.load %arg13[%c0_38, %c0_39] : memref<1x32xf32, #tpu.memory_space<vmem>>, vector<1x32xf32>
    %c0_40 = arith.constant 0 : index
    %c0_41 = arith.constant 0 : index
    %68 = vector.load %arg14[%c0_40, %c0_41] : memref<32x16xf32, #tpu.memory_space<vmem>>, vector<32x16xf32>
    %c0_42 = arith.constant 0 : index
    %c0_43 = arith.constant 0 : index
    %69 = vector.load %arg15[%c0_42, %c0_43] : memref<1x16xf32, #tpu.memory_space<vmem>>, vector<1x16xf32>
    %cst_44 = arith.constant dense<0.000000e+00> : vector<2x32xf32>
    %70 = tpu.matmul %65, %66, %cst_44 {dimension_numbers = #tpu.dot_dimension_numbers<[1], [0], [0], [1], [0, 0, 1, 1], [], []>} : vector<2x16xf32>, vector<16x32xf32>, vector<2x32xf32> -> vector<2x32xf32>
    %71 = vector.broadcast %67 : vector<1x32xf32> to vector<2x32xf32>
    %72 = arith.addf %70, %71 : vector<2x32xf32>
    %73 = arith.negf %72 : vector<2x32xf32>
    %74 = math.exp %73 : vector<2x32xf32>
    %cst_45 = arith.constant 1.000000e+00 : f32
    %75 = vector.broadcast %cst_45 : f32 to vector<2x32xf32>
    %76 = arith.addf %75, %74 : vector<2x32xf32>
    %77 = arith.divf %75, %76 : vector<2x32xf32>
    %78 = arith.mulf %72, %77 : vector<2x32xf32>
    %cst_46 = arith.constant dense<0.000000e+00> : vector<2x16xf32>
    %79 = tpu.matmul %78, %68, %cst_46 {dimension_numbers = #tpu.dot_dimension_numbers<[1], [0], [0], [1], [0, 0, 1, 1], [], []>} : vector<2x32xf32>, vector<32x16xf32>, vector<2x16xf32> -> vector<2x16xf32>
    %80 = vector.broadcast %69 : vector<1x16xf32> to vector<2x16xf32>
    %81 = arith.addf %79, %80 : vector<2x16xf32>
    %82 = arith.addf %65, %81 : vector<2x16xf32>
    %c0_47 = arith.constant 0 : index
    %c0_48 = arith.constant 0 : index
    %83 = vector.load %arg16[%c0_47, %c0_48] : memref<2x16xf32, #tpu.memory_space<vmem>>, vector<2x16xf32>
    tpu.vector_store %arg16[%c0_47, %c0_48], %82 {strides = array<i32>} : memref<2x16xf32, #tpu.memory_space<vmem>>, vector<2x16xf32>,
    %cst_49 = arith.constant dense<0.000000e+00> : vector<2x8xf32>
    %84 = vector.multi_reduction <add>, %43, %cst_49 [1] : vector<2x4x8xf32> to vector<2x8xf32>
    %cst_50 = arith.constant 4.000000e+00 : f32
    %85 = vector.broadcast %cst_50 : f32 to vector<2x8xf32>
    %86 = arith.divf %84, %85 : vector<2x8xf32>
    %c0_51 = arith.constant 0 : index
    %c0_52 = arith.constant 0 : index
    %87 = vector.load %arg17[%c0_51, %c0_52] : memref<2x8xf32, #tpu.memory_space<vmem>>, vector<2x8xf32>
    tpu.vector_store %arg17[%c0_51, %c0_52], %86 {strides = array<i32>} : memref<2x8xf32, #tpu.memory_space<vmem>>, vector<2x8xf32>,
    return
  }
}

</mosaic_0001>

<bundles_post_ra>
// kernel: tpu_custom_call.1
= control target key start
LH: loop header
LB: loop body
LE: loop exit
PB: predicated region body
PF: predicated region fallthrough
CT: control target
= control target key end

     0   :  { %s1579_s0 = inlined_call_operand.vmem [shape: f32[2,32], index: 0, kind: input, shape index: {}]   ;;  %s1580_s1 = inlined_call_operand.vmem [shape: f32[2,8,16], index: 1, kind: input, shape index: {}]   ;;  %s1581_s2 = inlined_call_operand.vmem [shape: f32[2,8], index: 2, kind: input, shape index: {}]   ;;  %s1582_s3 = inlined_call_operand.vmem [shape: f32[4,16], index: 3, kind: input, shape index: {}]   ;;  %s1583_s4 = inlined_call_operand.vmem [shape: f32[32,16], index: 4, kind: input, shape index: {}]   ;;  %s1584_s5 = inlined_call_operand.vmem [shape: f32[1,16], index: 5, kind: input, shape index: {}]   ;;  %s1585_s6 = inlined_call_operand.vmem [shape: f32[16,32], index: 6, kind: input, shape index: {}]   ;;  %s1586_s7 = inlined_call_operand.vmem [shape: f32[1,32], index: 7, kind: input, shape index: {}]   ;;  %s1587_s8 = inlined_call_operand.vmem [shape: f32[16,32], index: 8, kind: input, shape index: {}]   ;;  %s1588_s9 = inlined_call_operand.vmem [shape: f32[1,32], index: 9, kind: input, shape index: {}]   ;;  %s1589_s10 = inlined_call_operand.vmem [shape: f32[32,16], index: 10, kind: input, shape index: {}]   ;;  %s1590_s11 = inlined_call_operand.vmem [shape: f32[1,16], index: 11, kind: input, shape index: {}]   ;;  %s1591_s12 = inlined_call_operand.vmem [shape: f32[16,32], index: 12, kind: input, shape index: {}]   ;;  %s1592_s13 = inlined_call_operand.vmem [shape: f32[1,32], index: 13, kind: input, shape index: {}]   ;;  %s1593_s14 = inlined_call_operand.vmem [shape: f32[32,16], index: 14, kind: input, shape index: {}]   ;;  %s1594_s15 = inlined_call_operand.vmem [shape: f32[1,16], index: 15, kind: input, shape index: {}]   ;;  %s1595_s16 = inlined_call_operand.hbm [shape: f32[2,16], index: 16, kind: output, shape index: {0}]   ;;  %s1596_s17 = inlined_call_operand.hbm [shape: f32[2,8], index: 17, kind: output, shape index: {1}]  }
   0x1   :  { %1598 = sst [smem:[#allocation8_spill]] %s1579_s0 }
   0x2   :  { %1599 = sst [smem:[#allocation9_spill]] %s1580_s1 }
   0x3   :  { %23 = vsyncpa [#allocation3], 0  ;;  %v63_v0 = vld [vmem:[%s1583_s4] sm:$0xff]  ;;  %v64_v1 = vld [vmem:[%s1583_s4 + $0x8] sm:$0xff]  ;;  %v1309_v3 = vmov 0.0|0.0   ;;  %vm1310_vm0 = vmmov 0  }
   0x4   :  { %v65_v2 = vld [vmem:[%s1583_s4 + $0x10] sm:$0xff]  ;;  %1209 = vmatprep.subr.bf16.mxu0 %v1309_v3  ;;  %v1210_v4 = vpack.c.bf16 %v64_v1, %v63_v0  ;;  %v66_v5 = vld [vmem:[%s1583_s4 + $0x18] sm:$0xff]  ;;  %v1311_v6 = vmov 0.0   ;;  %v149_v7 = vld [vmem:[%s1585_s6] sm:$0xff]  ;;  %vm158_vm1 = vcmask 130048   ;;  %s1600_s23 = sld [smem:[#allocation9_spill]] }
   0x5   :  { %1143 = vmatprep.mubr.msk.f32.mxu0 %vm1310_vm0, %v1311_v6  ;;  %v150_v8 = vld [vmem:[%s1585_s6 + $0x8] sm:$0xff]  ;;  %v1213_v10 = vpack.c.bf16 %v66_v5, %v65_v2 }
   0x6   :  { %1211 = vmatpush3.bf16.msra.mxu0 %v1210_v4  ;;  %v1215_v11 = vpack.c.bf16 %v150_v8, %v149_v7 }
   0xa   :  { %v58_v9 = vld [vmem:[%s1600_s23] sm:$0xff] }
   0xb   :  { %1150 = vmatprep.mubr.msk.f32.mxu1 %vm158_vm1, %v58_v9 }
   0xc   :  { %24 = vsyncpa [#allocation5], 0  ;;  %1212 = vmatprep.subr.bf16.mxu0 %v1309_v3  ;;  %1216 = vmatprep.subr.bf16.mxu1 %v1215_v11  ;;  %v59_v12 = vld [vmem:[%s1600_s23 + $0x8] sm:$0xff]  ;;  %s1601_s26 = sld [smem:[#allocation8_spill]]  ;;  %vm74_vm2 = vcmask 261120   ;;  %v244_v16 = vlaneseq  ;;  %v1313_v41 = vmov 0  }
   0xd   :  { %1218 = vmatpush3.bf16.msra.mxu1 %v1215_v11  ;;  %1214 = vmatpush3.bf16.msra.mxu0 %v1213_v10  ;;  %v1312_v14 = vmov 1966171168   ;;  %v1083_v19 = vld [vmem:[%s1586_s7] ss:$0 sm:$0xff]  ;;  %vm466_vm7 = vcmask 60416   ;;  %vm492_vm9 = vcmask 64512  }
   0xe   :  { %1153 = vmatprep.subr.mxu1 %v1311_v6  ;;  %1158 = vmatprep.subr.mxu0 %v1311_v6  ;;  %v242_v15 = vunpack.c.l.s4 %v1312_v14  ;;  %v245_v18 = vshrl.u32 %v244_v16, 7  ;;  %v1081_v20 = vld [vmem:[%s1584_s5] ss:$0 sm:$0xff]  ;;  %vm675_vm10 = vcmask 1041409   ;;  %vm1051_vm11 = vcmask 58368  }
   0xf   :  { %v1463_v34 = vld [vmem:[%s1582_s3] sm:$0xf]  ;;  %vm644_vm12 = vcmask 125952  }
  0x10   :  { %1151 = vmatmul.mubr.msk.f32.vlgmr.msra.gmra.mrb[0].mxu1 %vm158_vm1, %v59_v12  ;;  %v243_v17 = vunpack.c.0.s8 %v242_v15  ;;  %v265_v31 = vsub.s32 0, %v245_v18  ;;  %v60_v40 = vld [vmem:[%s1581_s2] sm:$0x3]  ;;  %s1314_s2 = smov 112  }
  0x11   :  { %1155 = vmatprep.mubr.msk.f32.mxu1 %vm1310_vm0, %v1311_v6  ;;  %vm61_vm3 = vcmp.gt.f32.partialorder %v60_v40, 0.5 }
  0x12   :  { %v57_v13 = vld [vmem:[%s1601_s26] sm:$0x3]  ;;  %v246_v26 = vsub.s32 %v243_v17, %v245_v18  ;;  %v427_v42 = vsel %vm61_vm3, 1, %v1313_v41 }
  0x13   :  { %1144 = vmatmul.mubr.msk.f32.vlgmr.msra.gmra.mrb[0].mxu0 %vm74_vm2, %v57_v13 }
  0x14   :  { %1160 = vmatprep.mubr.msk.f32.mxu0 %vm1310_vm0, %v1311_v6  ;;  %v434_v43 = vrot.slane %v427_v42, %v246_v26 }
  0x16   :  { %v435_v44 = vcombine.high %v434_v43, %v434_v43  ;;  %v442_v45 = vrot.slane %v434_v43, %v246_v26 }
  0x18   :  { %v449_v46 = vrot.slane %v435_v44, %v246_v26  ;;  %vm450_vm4 = vcmp.ne.s32.totalorder %v442_v45, 0 }
  0x19   :  { %v452_v47 = vsel %vm450_vm4, 1, %v1313_v41 }
  0x1a   :  { %vm451_vm5 = vcmp.ne.s32.totalorder %v449_v46, 0  ;;  %v457_v49 = vrot.slane %v452_v47, %v265_v31 }
  0x1b   :  { %v453_v48 = vsel %vm451_vm5, 1, %v1313_v41 }
  0x1c   :  { %v461_v50 = vrot.slane %v453_v48, %v265_v31  ;;  %vm462_vm6 = vcmp.eq.s32.totalorder %v457_v49, 1 }
  0x1e   :  { %vm463_vm8 = vcmp.eq.s32.totalorder %v461_v50, 1 }
  0xe3   :  { %v1152_v21 = vpop.f32.mrb[0].mxu1 }
  0xe4   :  { %v1453_v23 = vadd.f32 %v1152_v21, %v1083_v19  ;;  %v231_v24 = vpop.f32.mrb[1].mxu1 }
  0xe5   :  { %v232_v28 = vadd.f32 %v1083_v19, %v231_v24 }
  0xe6   :  { %v144_v22 = vpop.f32.mrb[0].mxu0  ;;  %1159 = vmatpush3.xpose.msk.msra.mxu0 %vm158_vm1, %v1453_v23 }
  0xe7   :  { %v145_v25 = vadd.f32 %v1081_v20, %v144_v22  ;;  %v1145_v27 = vpop.f32.mrb[1].mxu0  ;;  %1154 = vmatpush3.xpose.msk.msra.mxu1 %vm158_vm1, %v232_v28  ;;  %1168 = vmatprep.subr.mxu0 %v1311_v6 }
  0xe8   :  { %1163 = vmatprep.subr.mxu1 %v1311_v6 }
  0xe9   :  { %v148_v29 = vmul.f32 0.5, %v145_v25 }
  0xeb   :  { %v247_v30 = vrot.slane %v148_v29, %v246_v26 }
  0xed   :  { %v248_v32 = vcombine.high %v247_v30, %v247_v30  ;;  %v255_v33 = vrot.slane %v247_v30, %v246_v26 }
  0xef   :  { %v262_v35 = vrot.slane %v248_v32, %v246_v26  ;;  %v266_v36 = vrot.slane %v255_v33, %v265_v31  ;;  %v659_v32 = vld [vmem:[%s1587_s8] sm:$0xff]  ;;  %v660_v33 = vld [vmem:[%s1587_s8 + $0x8] sm:$0xff]  ;;  %s1315_s8 = smov [#allocation4]  }
  0xf1   :  { %v270_v37 = vrot.slane %v262_v35, %v265_v31  ;;  %v273_v38 = vmul.f32 %v266_v36, %v1463_v34  ;;  %v1220_v35 = vpack.c.bf16 %v660_v33, %v659_v32 }
  0xf3   :  { %v274_v39 = vmul.f32 %v270_v37, %v1463_v34  ;;  %1156 = vmatmul.mubr.msk.f32.vlgmr.msra.gmra.mrb[2].mxu1 %vm158_vm1, %v273_v38 }
  0xf4   :  { %1165 = vmatprep.mubr.msk.f32.mxu1 %vm1310_vm0, %v1311_v6 }
  0xf5   :  { %1161 = vmatmul.mubr.msk.f32.vlgmr.msra.gmra.mrb[2].mxu0 %vm158_vm1, %v274_v39 }
  0xf6   :  { %1170 = vmatprep.mubr.msk.f32.mxu0 %vm1310_vm0, %v1311_v6 }
 0x1c6   :  { %v347_v51 = vpop.f32.mrb[2].mxu1 }
 0x1c7   :  { %v464_v52 = vsel %vm462_vm6, %v347_v51, 0.0  ;;  %v1157_v53 = vpop.f32.mrb[3].mxu1 }
 0x1c8   :  { %v423_v54 = vpop.f32.mrb[2].mxu0  ;;  %v467_v55 = vsel %vm466_vm7, %v464_v52, -inf }
 0x1c9   :  { %v465_v56 = vsel %vm463_vm8, %v423_v54, 0.0  ;;  %468 = vmax.xlane.f32.xlu0 %v467_v55  ;;  %v1162_v57 = vpop.f32.mrb[3].mxu0 }
 0x1ca   :  { %v470_v58 = vsel %vm466_vm7, %v465_v56, -inf  ;;  %v663_v57 = vld [vmem:[%s1589_s10 + $0x8] sm:$0xff] }
 0x1cd   :  { %471 = vmax.xlane.f32.xlu0 %v470_v58 }
 0x1e3   :  { %489 = vrot.lane.b32.xlu0 %v232_v28, %s1314_s2 }
 0x256   :  { %v469_v59 = vpop.xlane.xlu0 %468 }
 0x257   :  { %v473_v60 = vsub.f32 %v464_v52, %v469_v59  ;;  %v664_v59 = vld [vmem:[%s1589_s10 + $0x10] sm:$0xff] }
 0x259   :  { %v475_v61 = vmul.f32 1.442695, %v473_v60  ;;  %v665_v60 = vld [vmem:[%s1589_s10 + $0x18] sm:$0xff] }
 0x25a   :  { %v472_v62 = vpop.xlane.xlu0 %471 }
 0x25b   :  { %1245 = vpow2.f32 %v475_v61  ;;  %v474_v63 = vsub.f32 %v465_v56, %v472_v62  ;;  %v1226_v61 = vpack.c.bf16 %v665_v60, %v664_v59  ;;  %v1092_v62 = vld [vmem:[%s1588_s9] ss:$0 sm:$0xff] }
 0x25d   :  { %v477_v0 = vmul.f32 1.442695, %v474_v63 }
 0x25e   :  { %v490_v1 = vpop.permute.xlu0 %489 }
 0x25f   :  { %1247 = vpow2.f32 %v477_v0  ;;  %1164 = vmatpush3.msra.mxu1 %v490_v1 }
 0x260   :  { %1219 = vmatprep.subr.bf16.mxu1 %v1309_v3 }
 0x265   :  { %v1246_v2 = vpop.eup %1245 }
 0x266   :  { %v479_v4 = vsel %vm466_vm7, %v1246_v2, 0.0 }
 0x267   :  { %480 = vadd.xlane.f32.xlu1 %v479_v4 }
 0x269   :  { %v1248_v5 = vpop.eup %1247 }
 0x26a   :  { %v482_v7 = vsel %vm466_vm7, %v1248_v5, 0.0 }
 0x26b   :  { %483 = vadd.xlane.f32.xlu1 %v482_v7 }
 0x27c   :  { %566 = vrot.lane.b32.xlu1 %v1453_v23, %s1314_s2 }
 0x2f4   :  { %v481_v8 = vpop.xlane.xlu1 %480 }
 0x2f5   :  { %1249 = vrcp.f32 %v481_v8 }
 0x2f8   :  { %v484_v9 = vpop.xlane.xlu1 %483 }
 0x2f9   :  { %1251 = vrcp.f32 %v484_v9  ;;  %v841_v9 = vld [vmem:[%s1591_s12] sm:$0xff] }
 0x2fc   :  { %v567_v10 = vpop.permute.xlu1 %566 }
 0x2fd   :  { %1169 = vmatpush3.msra.mxu0 %v567_v10  ;;  %v842_v10 = vld [vmem:[%s1591_s12 + $0x8] sm:$0xff] }
 0x2fe   :  { %1222 = vmatprep.subr.bf16.mxu0 %v1309_v3 }
 0x2ff   :  { %v1250_v11 = vpop.eup %1249 }
 0x300   :  { %v487_v12 = vmul.f32 %v1250_v11, %v1246_v2  ;;  %v1229_v11 = vpack.c.bf16 %v842_v10, %v841_v9 }
 0x302   :  { %1166 = vmatmul.mubr.msk.f32.vlgmr.msra.gmra.mrb[4].mxu1 %vm492_vm9, %v487_v12  ;;  %v1030_v13 = vsel %vm466_vm7, %v487_v12, 0.0  ;;  %v1095_v12 = vld [vmem:[%s1590_s11] ss:$0 sm:$0xff] }
 0x303   :  { %v1252_v14 = vpop.eup %1251  ;;  %1177 = vmatprep.mubr.msk.f32.mxu1 %vm1310_vm0, %v1311_v6  ;;  %v1031_v15 = vrot.slane %v1030_v13, 4  ;;  %1221 = vmatpush3.bf16.msra.mxu1 %v1220_v35 }
 0x304   :  { %v488_v16 = vmul.f32 %v1252_v14, %v1248_v5  ;;  %1228 = vmatprep.subr.bf16.mxu1 %v1309_v3 }
 0x305   :  { %v1032_v17 = vadd.f32 %v1031_v15, %v1030_v13 }
 0x306   :  { %1171 = vmatmul.mubr.msk.f32.vlgmr.msra.gmra.mrb[4].mxu0 %vm492_vm9, %v488_v16  ;;  %v1037_v18 = vsel %vm466_vm7, %v488_v16, 0.0 }
 0x307   :  { %1188 = vmatprep.mubr.msk.f32.mxu0 %vm1310_vm0, %v1311_v6  ;;  %v1033_v19 = vrot.slane %v1032_v17, 2  ;;  %v1038_v20 = vrot.slane %v1037_v18, 4 }
 0x309   :  { %v1034_v21 = vadd.f32 %v1033_v19, %v1032_v17  ;;  %v1039_v22 = vadd.f32 %v1038_v20, %v1037_v18 }
 0x30b   :  { %v1035_v23 = vrot.slane %v1034_v21, 1  ;;  %v1040_v24 = vrot.slane %v1039_v22, 2 }
 0x30d   :  { %v1041_v25 = vadd.f32 %v1040_v24, %v1039_v22  ;;  %v1036_v26 = vadd.f32 %v1035_v23, %v1034_v21  ;;  %v844_v21 = vld [vmem:[%s1593_s14] sm:$0xff]  ;;  %v845_v22 = vld [vmem:[%s1593_s14 + $0x8] sm:$0xff]  ;;  %v846_v24 = vld [vmem:[%s1593_s14 + $0x10] sm:$0xff] }
 0x30e   :  { %v1232_v23 = vpack.c.bf16 %v845_v22, %v844_v21 }
 0x30f   :  { %v1042_v27 = vrot.slane %v1041_v25, 1  ;;  %v1045_v29 = vmul.f32 0.25, %v1036_v26  ;;  %v1097_v26 = vld [vmem:[%s1592_s13] ss:$0 sm:$0xff] }
 0x311   :  { %v1043_v28 = vadd.f32 %v1042_v27, %v1041_v25 }
 0x313   :  { %v1046_v30 = vmul.f32 0.25, %v1043_v28 }
 0x315   :  { %v1049_v31 = vsel %vm675_vm10, %v1046_v30, %v1045_v29 }
 0x316   :  { %1052 = vst.msk [vmem:[#allocation4] sm:$0x3] %vm1051_vm11, %v1049_v31 }
 0x3d5   :  { %v562_v36 = vpop.f32.mrb[4].mxu1 }
 0x3d6   :  { %v642_v37 = vmul.f32 %v562_v36, %v1463_v34  ;;  %v1167_v38 = vpop.f32.mrb[5].mxu1 }
 0x3d8   :  { %v645_v39 = vsel %vm644_vm12, %v642_v37, 0.0 }
 0x3d9   :  { %v646_v40 = vrot.slane %v645_v39, 4  ;;  %v638_v41 = vpop.f32.mrb[4].mxu0 }
 0x3da   :  { %v643_v42 = vmul.f32 %v638_v41, %v1463_v34  ;;  %v1172_v43 = vpop.f32.mrb[5].mxu0  ;;  %v662_v34 = vld [vmem:[%s1589_s10] sm:$0xff] }
 0x3db   :  { %v647_v44 = vadd.f32 %v646_v40, %v645_v39  ;;  %v1223_v58 = vpack.c.bf16 %v663_v57, %v662_v34 }
 0x3dc   :  { %v652_v45 = vsel %vm644_vm12, %v643_v42, 0.0 }
 0x3dd   :  { %v648_v46 = vrot.slane %v647_v44, 2  ;;  %v653_v47 = vrot.slane %v652_v45, 4  ;;  %1224 = vmatpush3.bf16.msra.mxu0 %v1223_v58 }
 0x3de   :  { %1225 = vmatprep.subr.bf16.mxu0 %v1309_v3 }
 0x3df   :  { %v649_v48 = vadd.f32 %v648_v46, %v647_v44  ;;  %v654_v49 = vadd.f32 %v653_v47, %v652_v45 }
 0x3e1   :  { %v655_v50 = vrot.slane %v654_v49, 2  ;;  %v650_v51 = vrot.slane %v649_v48, 1  ;;  %1227 = vmatpush3.bf16.msra.mxu0 %v1226_v61 }
 0x3e3   :  { %v656_v52 = vadd.f32 %v655_v50, %v654_v49  ;;  %v651_v54 = vadd.f32 %v650_v51, %v649_v48 }
 0x3e5   :  { %v657_v53 = vrot.slane %v656_v52, 1 }
 0x3e7   :  { %v658_v55 = vadd.f32 %v657_v53, %v656_v52 }
 0x3e9   :  { %v676_v56 = vsel %vm675_vm10, %v658_v55, %v651_v54 }
 0x3ea   :  { %1178 = vmatmul.mubr.msk.f32.vlgmr.msra.gmra.mrb[6].mxu1 %vm158_vm1, %v676_v56 }
 0x3eb   :  { %1195 = vmatprep.mubr.msk.f32.mxu1 %vm1310_vm0, %v1311_v6  ;;  %1230 = vmatpush3.bf16.msra.mxu1 %v1229_v11 }
 0x3ec   :  { %1231 = vmatprep.subr.bf16.mxu1 %v1309_v3 }
 0x4bd   :  { %v745_v63 = vpop.f32.mrb[6].mxu1 }
 0x4be   :  { %v746_v0 = vadd.f32 %v1092_v62, %v745_v63  ;;  %v1179_v1 = vpop.f32.mrb[7].mxu1 }
 0x4c0   :  { %v1094_v2 = vmul.f32 -1.442695, %v746_v0 }
 0x4c2   :  { %1253 = vpow2.f32 %v1094_v2 }
 0x4cc   :  { %v1254_v4 = vpop.eup %1253 }
 0x4cd   :  { %v752_v5 = vadd.f32 1.0, %v1254_v4 }
 0x4cf   :  { %1255 = vrcp.f32 %v752_v5 }
 0x4d9   :  { %v1256_v7 = vpop.eup %1255 }
 0x4da   :  { %v755_v8 = vmul.f32 %v1256_v7, %v746_v0 }
 0x4dc   :  { %1189 = vmatmul.mubr.msk.f32.vlgmr.msra.gmra.mrb[6].mxu0 %vm74_vm2, %v755_v8 }
 0x5af   :  { %v831_v13 = vpop.f32.mrb[6].mxu0 }
 0x5b0   :  { %v832_v14 = vadd.f32 %v1095_v12, %v831_v13  ;;  %v1190_v15 = vpop.f32.mrb[7].mxu0 }
 0x5b2   :  { %v836_v16 = vrot.slane %v832_v14, 1  ;;  %v839_v18 = vadd.f32 %v832_v14, %v651_v54 }
 0x5b4   :  { %v840_v17 = vadd.f32 %v836_v16, %v658_v55 }
 0x5b6   :  { %v857_v19 = vrot.slane %v840_v17, 7 }
 0x5b8   :  { %v858_v20 = vsel %vm675_vm10, %v857_v19, %v839_v18 }
 0x5b9   :  { %1196 = vmatmul.mubr.msk.f32.vlgmr.msra.gmra.mrb[8].mxu1 %vm158_vm1, %v858_v20 }
 0x5ba   :  { %1206 = vmatprep.mubr.msk.f32.mxu1 %vm1310_vm0, %v1311_v6  ;;  %1233 = vmatpush3.bf16.msra.mxu1 %v1232_v23  ;;  %v847_v6 = vld [vmem:[%s1593_s14 + $0x18] sm:$0xff]  ;;  %s1069_s14 = sshll.u32 %s1315_s8, 4  ;;  %s1070_s14 = int_to_ptr.vmem [resolvable:$true] %s1069_s14 }
 0x5bb   :  { %1234 = vmatprep.subr.bf16.mxu1 %v1309_v3  ;;  %v1235_v25 = vpack.c.bf16 %v847_v6, %v846_v24  ;;  %s1261_s21 = scalar_lea.vmem %s1070_s14, 32  ;;  %p1266_p1 = scmp.lt.s32.totalorder %s1070_s14, %s1070_s14 }
 0x5bc   :  { %p1262_p0 = scmp.ne.s32.totalorder %s1070_s14, %s1261_s21  ;;  %p1267_p2 = scmp.lt.s32.totalorder %s1261_s21, %s1261_s21 }
 0x5be   :  { %1236 = vmatpush3.bf16.msra.mxu1 %v1235_v25  ;;  %p1268_p3 = por %p1267_p2, %p1266_p1 }
 0x5c0   :  { %p1269_p4 = pnand %p1268_p3, %p1262_p0 }
 0x68c   :  { %v927_v27 = vpop.f32.mrb[8].mxu1 }
 0x68d   :  { %v928_v28 = vadd.f32 %v1097_v26, %v927_v27  ;;  %v1197_v29 = vpop.f32.mrb[9].mxu1 }
 0x68f   :  { %v1099_v30 = vmul.f32 -1.442695, %v928_v28 }
 0x691   :  { %1257 = vpow2.f32 %v1099_v30 }
 0x69b   :  { %v1258_v3 = vpop.eup %1257 }
 0x69c   :  { %v934_v31 = vadd.f32 1.0, %v1258_v3 }
 0x69e   :  { %1259 = vrcp.f32 %v934_v31 }
 0x6a8   :  { %v1260_v32 = vpop.eup %1259 }
 0x6a9   :  { %v937_v33 = vmul.f32 %v1260_v32, %v928_v28 }
 0x6ab   :  { %1207 = vmatmul.mubr.msk.f32.vlgmr.msra.gmra.mrb[10].mxu1 %vm74_vm2, %v937_v33 }
 0x6ac   :  { %1272 = shalt.err (!%p1269_p4)
}
 0x6ad   :  { %s1273_s23 = scalar_lea.hbm %s1596_s17, 32 }
 0x6ae   :  { %p1274_p5 = scmp.ne.s32.totalorder %s1596_s17, %s1273_s23  ;;  %p1277_p6 = scmp.lt.u32.totalorder %s1273_s23, %s1596_s17 }
 0x6b0   :  { %p1279_p7 = pnand %p1277_p6, %p1274_p5 }
 0x6b2   :  { %1282 = shalt.err (!%p1279_p7)
}
 0x6b3   :  { %1072 = dma.vmem_to_hbm [thread:$0]  %s1070_s14, 32, %s1596_s17, [#allocation5]   ;;  %v1100_v35 = vld [vmem:[%s1594_s15] ss:$0 sm:$0xff]  ;;  %vm1028_vm13 = vcmask 123904  }
 0x6b4   :  { %s1316_s29 = smov [#allocation2]  }
 0x6b5   :  { %s1059_s0 = sshll.u32 %s1316_s29, 4  ;;  %s1060_s0 = int_to_ptr.vmem [resolvable:$true] %s1059_s0 }
 0x6b6   :  { %s1283_s9 = scalar_lea.vmem %s1060_s0, 32  ;;  %p1288_p9 = scmp.lt.s32.totalorder %s1060_s0, %s1060_s0 }
 0x6b7   :  { %p1284_p8 = scmp.ne.s32.totalorder %s1060_s0, %s1283_s9  ;;  %p1289_p10 = scmp.lt.s32.totalorder %s1283_s9, %s1283_s9 }
 0x6b9   :  { %p1290_p11 = por %p1289_p10, %p1288_p9 }
 0x6bb   :  { %p1291_p12 = pnand %p1290_p11, %p1284_p8 }
 0x77e   :  { %v1013_v36 = vpop.f32.mrb[10].mxu1 }
 0x77f   :  { %v1014_v37 = vadd.f32 %v1100_v35, %v1013_v36  ;;  %v1208_v38 = vpop.f32.mrb[11].mxu1 }
 0x781   :  { %v1018_v39 = vrot.slane %v1014_v37, 1  ;;  %v1021_v41 = vadd.f32 %v1014_v37, %v839_v18 }
 0x783   :  { %v1022_v40 = vadd.f32 %v1018_v39, %v840_v17 }
 0x785   :  { %v1025_v42 = vrot.slane %v1022_v40, 7 }
 0x787   :  { %v1026_v43 = vsel %vm675_vm10, %v1025_v42, %v1021_v41 }
 0x788   :  { %1029 = vst.msk [vmem:[#allocation2] sm:$0x3] %vm1028_vm13, %v1026_v43 }
 0x789   :  { %1294 = shalt.err (!%p1291_p12)
}
 0x78a   :  { %s1295_s5 = scalar_lea.hbm %s1595_s16, 32 }
 0x78b   :  { %p1296_p13 = scmp.ne.s32.totalorder %s1595_s16, %s1295_s5  ;;  %p1299_p0 = scmp.lt.u32.totalorder %s1295_s5, %s1595_s16 }
 0x78d   :  { %p1301_p1 = pnand %p1299_p0, %p1296_p13 }
 0x78f   :  { %1304 = shalt.err (!%p1301_p1)
}
 0x790   :  { %1062 = dma.vmem_to_hbm [thread:$0]  %s1060_s0, 32, %s1595_s16, [#allocation3]  }
 0x791   :  { %1305 = dma.done.wait [#allocation3], 32  }
 0x792   :  { %1306 = vsyncadd [#allocation3], 4294967264 }
 0x793   :  { %1307 = dma.done.wait [#allocation5], 32  }
 0x794   :  { %1308 = vsyncadd [#allocation5], 4294967264 }
 0x795   :  { %1079 = vsyncpa [#allocation3], 1 }
 0x796   :  { %1080 = vsyncpa [#allocation5], 1 }

</bundles_post_ra>
